<compile_context>
chip_gen: v7x
topology: tpu7x:2x2x1
jax: 0.10.0
libtpu: 0.0.40
codegen_flags: <defaults>
</compile_context>

<pallas_src>
import jax
import jax.numpy as jnp
from jax.experimental import pallas as pl
from jax.experimental.pallas import tpu as pltpu


def _mlp_kernel(x_ref, w1_ref, b1_ref, w2_ref, b2_ref, o_ref):
    # x_ref : (TB, K) f32, w1_ref: (K, E) f32, b1_ref: (1, E) f32
    # w2_ref: (E, E) bf16,  b2_ref: (1, E) f32
    h = jnp.dot(x_ref[...], w1_ref[...], preferred_element_type=jnp.float32)
    h = jnp.maximum(h + b1_ref[...], 0.0)                     # ReLU, f32 on VPU
    o = jnp.dot(h.astype(jnp.bfloat16), w2_ref[...],          # bf16 -> MXU
                preferred_element_type=jnp.float32)            # f32 accumulate
    o = jnp.maximum(o + b2_ref[...], 0.0)
    o_ref[...] = o.astype(o_ref.dtype)


def _round_up(n, m):
    return ((n + m - 1) // m) * m


# Largest single-block / per-tile batch size.  At 1024 rows the resident
# footprint (x 60 KiB*2, out 2 MiB*2, h/o temps ~4 MiB, w1+w2+b1+b2 ~0.55 MiB)
# is ~9 MiB -- inside every generation's default scoped VMEM.
MAX_TILE_B = 1024


def clinical_data_processor(x, w1, b1, w2, b2, *, max_tile_b=MAX_TILE_B,
                            out_dtype=jnp.float32):
    """x: (B, input_dim) f32; w1: (input_dim, E); b1: (E,); w2: (E, E); b2: (E,).

    Layer 1 runs in f32; layer 2 uses bf16 MXU operands with f32 accumulation.
    """
    B, K = x.shape
    E = w1.shape[1]

    x = x.astype(jnp.float32)
    w1_f32 = w1.astype(jnp.float32)
    b1_row = b1.reshape(1, E).astype(jnp.float32)
    w2_bf = w2.astype(jnp.bfloat16)          # halves the dominant weight DMA
    b2_row = b2.reshape(1, E).astype(jnp.float32)

    if B <= max_tile_b:
        # Single block, no grid: no pipelining machinery / per-step overhead.
        b_pad = _round_up(max(B, 8), 8)
        x_in = x if b_pad == B else jnp.pad(x, ((0, b_pad - B), (0, 0)))
        vmem = pl.BlockSpec(memory_space=pltpu.MemorySpace.VMEM)
        out = pl.pallas_call(
            _mlp_kernel,
            out_shape=jax.ShapeDtypeStruct((b_pad, E), out_dtype),
            in_specs=[vmem, vmem, vmem, vmem, vmem],
            out_specs=vmem,
        )(x_in, w1_f32, b1_row, w2_bf, b2_row)
        return out if b_pad == B else out[:B]

    # Batch-tiled grid path.  Use an even tile count (>= 2) so the "parallel"
    # axis splits evenly across v7x's two TensorCores; weights stay resident
    # across batch tiles via constant index_maps.
    num_tiles = -(-B // max_tile_b)
    if num_tiles % 2:
        num_tiles += 1
    tile_b = _round_up(-(-B // num_tiles), 8)
    b_pad = num_tiles * tile_b
    x_in = x if b_pad == B else jnp.pad(x, ((0, b_pad - B), (0, 0)))

    out = pl.pallas_call(
        _mlp_kernel,
        out_shape=jax.ShapeDtypeStruct((b_pad, E), out_dtype),
        grid_spec=pltpu.PrefetchScalarGridSpec(
            num_scalar_prefetch=0,
            grid=(num_tiles,),
            in_specs=[
                pl.BlockSpec((tile_b, K), lambda i: (i, 0)),
                pl.BlockSpec((K, E), lambda i: (0, 0)),    # w1 resident
                pl.BlockSpec((1, E), lambda i: (0, 0)),    # b1 resident
                pl.BlockSpec((E, E), lambda i: (0, 0)),    # w2 resident
                pl.BlockSpec((1, E), lambda i: (0, 0)),    # b2 resident
            ],
            out_specs=pl.BlockSpec((tile_b, E), lambda i: (i, 0)),
        ),
        compiler_params=pltpu.CompilerParams(
            dimension_semantics=("parallel",),  # independent batch tiles (megacore)
        ),
    )(x_in, w1_f32, b1_row, w2_bf, b2_row)
    return out if b_pad == B else out[:B]


def reference_mixed(x, w1, b1, w2, b2):
    """Plain-JAX reference mirroring the kernel numerics (layer1 f32, layer2 bf16/f32-acc)."""
    h = jnp.maximum(jnp.dot(x, w1, preferred_element_type=jnp.float32)
                    + b1.reshape(1, -1), 0.0)
    o = jnp.dot(h.astype(jnp.bfloat16), w2.astype(jnp.bfloat16),
                preferred_element_type=jnp.float32) + b2.reshape(1, -1)
    return jnp.maximum(o, 0.0)


def reference_f32(x, w1, b1, w2, b2):
    """Full-precision reference of the original torch forward pass."""
    h = jnp.maximum(x @ w1 + b1.reshape(1, -1), 0.0)
    return jnp.maximum(h @ w2 + b2.reshape(1, -1), 0.0)


if __name__ == "__main__":
    input_dim = 15
    embed_dim = 512

    key = jax.random.PRNGKey(0)
    k_x1, k_x2, k_w1, k_b1, k_w2, k_b2 = jax.random.split(key, 6)

    # torch.nn.Linear-style init: U(-1/sqrt(fan_in), 1/sqrt(fan_in))
    lim1 = 1.0 / (input_dim ** 0.5)
    lim2 = 1.0 / (embed_dim ** 0.5)
    w1 = jax.random.uniform(k_w1, (input_dim, embed_dim), jnp.float32, -lim1, lim1)
    b1 = jax.random.uniform(k_b1, (embed_dim,), jnp.float32, -lim1, lim1)
    w2 = jax.random.uniform(k_w2, (embed_dim, embed_dim), jnp.float32, -lim2, lim2)
    b2 = jax.random.uniform(k_b2, (embed_dim,), jnp.float32, -lim2, lim2)

    # Small batch -> single-block (no-grid) path.
    x_small = jax.random.normal(k_x1, (4, input_dim), jnp.float32)
    out_small = jax.block_until_ready(clinical_data_processor(x_small, w1, b1, w2, b2))

    # Mid-size batch with a reduced max_tile_b to exercise the grid path:
    # 640 rows -> 4 tiles of 160 (even tile count, no padding, no slicing).
    x_grid = jax.random.normal(k_x2, (640, input_dim), jnp.float32)
    out_grid = jax.block_until_ready(
        clinical_data_processor(x_grid, w1, b1, w2, b2, max_tile_b=256))

    for x, out in ((x_small, out_small), (x_grid, out_grid)):
        assert out.shape == (x.shape[0], embed_dim)
        ref_m = reference_mixed(x, w1, b1, w2, b2)
        ref_f = reference_f32(x, w1, b1, w2, b2)
        # Check against the reference that mirrors the kernel's mixed precision.
        assert jnp.allclose(out, ref_m, atol=2e-2, rtol=2e-2)
        # Looser sanity check against the full-f32 torch-equivalent forward.
        assert jnp.allclose(out, ref_f, atol=6e-2, rtol=6e-2)

    print("KERNEL_OK")
</pallas_src>

<mosaic_0001>
module attributes {stable_mosaic.version = 11 : i64} {
  func.func @_mlp_kernel(%arg0: memref<8x15xf32, #tpu.memory_space<vmem>>, %arg1: memref<15x512xf32, #tpu.memory_space<vmem>>, %arg2: memref<1x512xf32, #tpu.memory_space<vmem>>, %arg3: memref<512x512xbf16, #tpu.memory_space<vmem>>, %arg4: memref<1x512xf32, #tpu.memory_space<vmem>>, %arg5: memref<8x512xf32, #tpu.memory_space<vmem>>) attributes {dimension_semantics = [], scalar_prefetch = 0 : i64, scratch_operands = 0 : i64, tpu.core_type = #tpu.core_type<tc>} {
    %c0 = arith.constant 0 : index
    %c0_0 = arith.constant 0 : index
    %0 = vector.load %arg0[%c0, %c0_0] : memref<8x15xf32, #tpu.memory_space<vmem>>, vector<8x15xf32>
    %c0_1 = arith.constant 0 : index
    %c0_2 = arith.constant 0 : index
    %1 = vector.load %arg1[%c0_1, %c0_2] : memref<15x512xf32, #tpu.memory_space<vmem>>, vector<15x512xf32>
    %cst = arith.constant dense<0.000000e+00> : vector<8x512xf32>
    %2 = tpu.matmul %0, %1, %cst {dimension_numbers = #tpu.dot_dimension_numbers<[1], [0], [0], [1], [0, 0, 1, 1], [], []>} : vector<8x15xf32>, vector<15x512xf32>, vector<8x512xf32> -> vector<8x512xf32>
    %c0_3 = arith.constant 0 : index
    %c0_4 = arith.constant 0 : index
    %3 = vector.load %arg2[%c0_3, %c0_4] : memref<1x512xf32, #tpu.memory_space<vmem>>, vector<1x512xf32>
    %4 = vector.broadcast %3 : vector<1x512xf32> to vector<8x512xf32>
    %5 = arith.addf %2, %4 : vector<8x512xf32>
    %cst_5 = arith.constant 0.000000e+00 : f32
    %6 = vector.broadcast %cst_5 : f32 to vector<8x512xf32>
    %7 = arith.maximumf %5, %6 : vector<8x512xf32>
    %8 = arith.truncf %7 : vector<8x512xf32> to vector<8x512xbf16>
    %c0_6 = arith.constant 0 : index
    %c0_7 = arith.constant 0 : index
    %9 = vector.load %arg3[%c0_6, %c0_7] : memref<512x512xbf16, #tpu.memory_space<vmem>>, vector<512x512xbf16>
    %cst_8 = arith.constant dense<0.000000e+00> : vector<8x512xf32>
    %10 = tpu.matmul %8, %9, %cst_8 {dimension_numbers = #tpu.dot_dimension_numbers<[1], [0], [0], [1], [0, 0, 1, 1], [], []>} : vector<8x512xbf16>, vector<512x512xbf16>, vector<8x512xf32> -> vector<8x512xf32>
    %c0_9 = arith.constant 0 : index
    %c0_10 = arith.constant 0 : index
    %11 = vector.load %arg4[%c0_9, %c0_10] : memref<1x512xf32, #tpu.memory_space<vmem>>, vector<1x512xf32>
    %12 = vector.broadcast %11 : vector<1x512xf32> to vector<8x512xf32>
    %13 = arith.addf %10, %12 : vector<8x512xf32>
    %cst_11 = arith.constant 0.000000e+00 : f32
    %14 = vector.broadcast %cst_11 : f32 to vector<8x512xf32>
    %15 = arith.maximumf %13, %14 : vector<8x512xf32>
    %c0_12 = arith.constant 0 : index
    %c0_13 = arith.constant 0 : index
    %16 = vector.load %arg5[%c0_12, %c0_13] : memref<8x512xf32, #tpu.memory_space<vmem>>, vector<8x512xf32>
    tpu.vector_store %arg5[%c0_12, %c0_13], %15 {strides = array<i32>} : memref<8x512xf32, #tpu.memory_space<vmem>>, vector<8x512xf32>,
    return
  }
}

</mosaic_0001>

<bundles_post_ra>
// kernel: tpu_custom_call.1
= control target key start
LH: loop header
LB: loop body
LE: loop exit
PB: predicated region body
PF: predicated region fallthrough
CT: control target
= control target key end

     0   :  { %10 = vsyncpa [#allocation3], 0  ;;  %s1823_s0 = inlined_call_operand.hbm [shape: f32[8,15], index: 0, kind: input, shape index: {}]   ;;  %s1824_s1 = inlined_call_operand.hbm [shape: f32[15,512], index: 1, kind: input, shape index: {}]   ;;  %s1825_s2 = inlined_call_operand.vmem [shape: f32[1,512], index: 2, kind: input, shape index: {}]   ;;  %s1826_s3 = inlined_call_operand.hbm [shape: bf16[512,512], index: 3, kind: input, shape index: {}]   ;;  %s1827_s4 = inlined_call_operand.vmem [shape: f32[1,512], index: 4, kind: input, shape index: {}]   ;;  %s1828_s5 = inlined_call_operand.hbm [shape: f32[8,512], index: 5, kind: output, shape index: {}]  }
   0x1   :  { %11 = vsyncpa [#allocation6], 0 }
   0x2   :  { %12 = vsyncpa [#allocation4], 0  ;;  %s1690_s18 = smov [#allocation5]   ;;  %s1596_s22 = scalar_lea.hbm %s1824_s1, 1024 }
   0x3   :  { %s28_s19 = sshll.u32 %s1690_s18, 4  ;;  %p1597_p0 = scmp.ne.s32.totalorder %s1824_s1, %s1596_s22  ;;  %s29_s19 = int_to_ptr.vmem [resolvable:$true] %s28_s19 }
   0x4   :  { %p1600_p1 = scmp.lt.u32.totalorder %s1596_s22, %s1824_s1 }
   0x6   :  { %p1602_p2 = pnand %p1600_p1, %p1597_p0 }
   0x8   :  { %1605 = shalt.err (!%p1602_p2)
}
   0x9   :  { %s1606_s27 = scalar_lea.vmem %s29_s19, 1024  ;;  %p1611_p4 = scmp.lt.s32.totalorder %s29_s19, %s29_s19 }
   0xa   :  { %p1607_p3 = scmp.ne.s32.totalorder %s29_s19, %s1606_s27  ;;  %p1612_p5 = scmp.lt.s32.totalorder %s1606_s27, %s1606_s27 }
   0xc   :  { %p1613_p6 = por %p1612_p5, %p1611_p4 }
   0xe   :  { %p1614_p7 = pnand %p1613_p6, %p1607_p3 }
  0x10   :  { %1617 = shalt.err (!%p1614_p7)
}
  0x11   :  { %s1691_s28 = smov 512   ;;  %s1692_s29 = smov 32  }
  0x12   :  { %34 = dma.hbm_to_vmem [thread:$0]  %s1824_s1, 1024, %s29_s19, [#allocation6], %s1691_s28, %s1691_s28, %s1692_s29  }
  0x13   :  { %s1693_s7 = smov [#allocation2]   ;;  %s1694_s9 = smov [#allocation7]  }
  0x14   :  { %s19_s8 = sshll.u32 %s1693_s7, 4  ;;  %s42_s10 = sshll.u32 %s1694_s9, 4  ;;  %s20_s8 = int_to_ptr.vmem [resolvable:$true] %s19_s8  ;;  %s43_s10 = int_to_ptr.vmem [resolvable:$true] %s42_s10 }
  0x15   :  { %s1618_s13 = scalar_lea.hbm %s1823_s0, 128 }
  0x16   :  { %p1619_p8 = scmp.ne.s32.totalorder %s1823_s0, %s1618_s13  ;;  %p1622_p9 = scmp.lt.u32.totalorder %s1618_s13, %s1823_s0 }
  0x18   :  { %p1624_p10 = pnand %p1622_p9, %p1619_p8 }
  0x1a   :  { %1627 = shalt.err (!%p1624_p10)
}
  0x1b   :  { %s1628_s1 = scalar_lea.vmem %s20_s8, 128  ;;  %p1633_p12 = scmp.lt.s32.totalorder %s20_s8, %s20_s8 }
  0x1c   :  { %p1629_p11 = scmp.ne.s32.totalorder %s20_s8, %s1628_s1  ;;  %p1634_p13 = scmp.lt.s32.totalorder %s1628_s1, %s1628_s1 }
  0x1e   :  { %p1635_p0 = por %p1634_p13, %p1633_p12 }
  0x20   :  { %p1636_p1 = pnand %p1635_p0, %p1629_p11 }
  0x22   :  { %1639 = shalt.err (!%p1636_p1)
}
  0x23   :  { %22 = dma.hbm_to_vmem [thread:$0]  %s1823_s0, 128, %s20_s8, [#allocation3]  }
  0x24   :  { %s1640_s22 = scalar_lea.hbm %s1826_s3, 16384 }
  0x25   :  { %p1641_p2 = scmp.ne.s32.totalorder %s1826_s3, %s1640_s22  ;;  %p1644_p3 = scmp.lt.u32.totalorder %s1640_s22, %s1826_s3 }
  0x27   :  { %p1646_p4 = pnand %p1644_p3, %p1641_p2 }
  0x29   :  { %1649 = shalt.err (!%p1646_p4)
}
  0x2a   :  { %s1650_s27 = scalar_lea.vmem %s43_s10, 16384  ;;  %p1655_p6 = scmp.lt.s32.totalorder %s43_s10, %s43_s10 }
  0x2b   :  { %p1651_p5 = scmp.ne.s32.totalorder %s43_s10, %s1650_s27  ;;  %p1656_p7 = scmp.lt.s32.totalorder %s1650_s27, %s1650_s27 }
  0x2d   :  { %p1657_p8 = por %p1656_p7, %p1655_p6 }
  0x2f   :  { %p1658_p9 = pnand %p1657_p8, %p1651_p5 }
  0x31   :  { %1661 = shalt.err (!%p1658_p9)
}
  0x32   :  { %s1695_s0 = smov 256   ;;  %s1696_s28 = smov 16  }
  0x33   :  { %48 = dma.hbm_to_vmem [thread:$0]  %s1826_s3, 16384, %s43_s10, [#allocation6], %s1695_s0, %s1695_s0, %s1696_s28  }
  0x34   :  { %1684 = dma.done.wait [#allocation3], 128  }
  0x35   :  { %1685 = vsyncadd [#allocation3], 4294967168 }
  0x36   :  { %1686 = dma.done.wait [#allocation6], 17408  }
  0x37   :  { %1687 = vsyncadd [#allocation6], 4294949888  ;;  %v1697_v0 = vmov 0.0   ;;  %vm95_vm0 = vcmask 1046528   ;;  %vm1698_vm1 = vmmov 1   ;;  %v62_v2 = vld [vmem:[#allocation5 + $0x8] sm:$0xff] }
  0x38   :  { %172 = vmatprep.mubr.f32.mxu0 %v1697_v0  ;;  %243 = vmatprep.mubr.f32.mxu1 %v1697_v0  ;;  %vm1766_vm2 = vmpackc.low %vm95_vm0, %vm1698_vm1  ;;  %v66_v3 = vld [vmem:[#allocation5 + $0x28] sm:$0x7f]  ;;  %v61_v4 = vld [vmem:[#allocation5] sm:$0xff]  ;;  %vm91_vm3 = vcmask 121856   ;;  %s1699_s8 = smov [#allocation8]  }
  0x39   :  { %v1370_v5 = vpack.c.bf16 %v66_v3, %v62_v2  ;;  %v65_v6 = vld [vmem:[#allocation5 + $0x20] sm:$0x7f]  ;;  %v64_v7 = vld [vmem:[#allocation5 + $0x18] sm:$0xff]  ;;  %v63_v11 = vld [vmem:[#allocation5 + $0x10] sm:$0xff]  ;;  %s1226_s9 = sshll.u32 %s1699_s8, 4  ;;  %s1227_s9 = int_to_ptr.vmem [resolvable:$true] %s1226_s9 }
  0x3a   :  { %v1373_v8 = vpack.c.bf16 %v65_v6, %v61_v4  ;;  %v60_v9 = vld [vmem:[#allocation2] sm:$0xff]  ;;  %v67_v12 = vld [vmem:[#allocation5 + $0x30] sm:$0x7f]  ;;  %p1667_p11 = scmp.lt.s32.totalorder %s1227_s9, %s1227_s9 }
  0x3b   :  { %v68_v10 = vld [vmem:[#allocation5 + $0x38] sm:$0x7f]  ;;  %1372 = vmatprep.subr.msk.bf16.mxu0 %vm1766_vm2, %v1370_v5  ;;  %v1379_v14 = vpack.c.bf16 %v67_v12, %v63_v11  ;;  %v1404_v15 = vld [vmem:[#allocation7] ss:$16 sps:$4 sm:$0xff]   ;;  %v1406_v16 = vld [vmem:[#allocation7 + $0x4] ss:$16 sps:$4 sm:$0xff]  }
  0x3c   :  { %v1376_v13 = vpack.c.bf16 %v68_v10, %v64_v7  ;;  %1375 = vmatpush1.bf16.msk.msra.mxu0 %vm1766_vm2, %v1373_v8  ;;  %v1409_v17 = vld [vmem:[#allocation7 + $0xc] ss:$16 sps:$4 sm:$0xff]   ;;  %v1407_v18 = vld [vmem:[#allocation7 + $0x8] ss:$16 sps:$4 sm:$0xff]   ;;  %v1412_v19 = vld [vmem:[#allocation7 + $0x24] ss:$16 sps:$4 sm:$0xff]  }
  0x3d   :  { %1048 = vmatprep.subr.bf16.mxu0 %v1406_v16  ;;  %v1410_v20 = vld [vmem:[#allocation7 + $0x20] ss:$16 sps:$4 sm:$0xff]   ;;  %v1415_v21 = vld [vmem:[#allocation7 + $0x2c] ss:$16 sps:$4 sm:$0xff]   ;;  %v1418_v22 = vld [vmem:[#allocation7 + $0x44] ss:$16 sps:$4 sm:$0xff]  }
  0x3e   :  { %1378 = vmatprep.subr.msk.bf16.mxu1 %vm1766_vm2, %v1376_v13  ;;  %v1413_v23 = vld [vmem:[#allocation7 + $0x28] ss:$16 sps:$4 sm:$0xff]   ;;  %v1421_v24 = vld [vmem:[#allocation7 + $0x4c] ss:$16 sps:$4 sm:$0xff]   ;;  %v1416_v25 = vld [vmem:[#allocation7 + $0x40] ss:$16 sps:$4 sm:$0xff]  }
  0x3f   :  { %1381 = vmatpush1.bf16.msk.msra.mxu1 %vm1766_vm2, %v1379_v14  ;;  %1238 = vmatmul.mubr.msk.f32.vlgmr.msra.gmra.mrb[0].mxu0 %vm91_vm3, %v60_v9  ;;  %v1424_v26 = vld [vmem:[#allocation7 + $0x64] ss:$16 sps:$4 sm:$0xff]   ;;  %v1419_v27 = vld [vmem:[#allocation7 + $0x48] ss:$16 sps:$4 sm:$0xff]   ;;  %v1427_v28 = vld [vmem:[#allocation7 + $0x6c] ss:$16 sps:$4 sm:$0xff]  }
  0x40   :  { %1130 = vmatprep.subr.bf16.mxu1 %v1409_v17  ;;  %1049 = vmatpush1.bf16.msra.mxu0 %v1404_v15  ;;  %v1422_v29 = vld [vmem:[#allocation7 + $0x60] ss:$16 sps:$4 sm:$0xff]   ;;  %v1430_v30 = vld [vmem:[#allocation7 + $0x84] ss:$16 sps:$4 sm:$0xff]   ;;  %v1425_v31 = vld [vmem:[#allocation7 + $0x68] ss:$16 sps:$4 sm:$0xff]   ;;  %v71_v17 = vlaneseq }
  0x41   :  { %1050 = vmatprep.subr.bf16.mxu0 %v1412_v19  ;;  %v1433_v32 = vld [vmem:[#allocation7 + $0x8c] ss:$16 sps:$4 sm:$0xff]   ;;  %v1428_v33 = vld [vmem:[#allocation7 + $0x80] ss:$16 sps:$4 sm:$0xff]   ;;  %v1436_v34 = vld [vmem:[#allocation7 + $0xa4] ss:$16 sps:$4 sm:$0xff]  }
  0x42   :  { %1241 = vmatmul.mubr.msk.f32.vlgmr.msra.gmra.mrb[0].mxu1 %vm91_vm3, %v60_v9  ;;  %v1431_v35 = vld [vmem:[#allocation7 + $0x88] ss:$16 sps:$4 sm:$0xff]   ;;  %v1439_v36 = vld [vmem:[#allocation7 + $0xac] ss:$16 sps:$4 sm:$0xff]   ;;  %v1434_v37 = vld [vmem:[#allocation7 + $0xa0] ss:$16 sps:$4 sm:$0xff]  }
  0x43   :  { %1131 = vmatpush1.bf16.msra.mxu1 %v1407_v18  ;;  %v1442_v38 = vld [vmem:[#allocation7 + $0xc4] ss:$16 sps:$4 sm:$0xff]   ;;  %v1437_v39 = vld [vmem:[#allocation7 + $0xa8] ss:$16 sps:$4 sm:$0xff]   ;;  %v1445_v40 = vld [vmem:[#allocation7 + $0xcc] ss:$16 sps:$4 sm:$0xff]  }
  0x44   :  { %1132 = vmatprep.subr.bf16.mxu1 %v1415_v21  ;;  %1051 = vmatpush1.bf16.msra.mxu0 %v1410_v20  ;;  %v1440_v41 = vld [vmem:[#allocation7 + $0xc0] ss:$16 sps:$4 sm:$0xff]   ;;  %v1448_v42 = vld [vmem:[#allocation7 + $0xe4] ss:$16 sps:$4 sm:$0xff]   ;;  %v1443_v43 = vld [vmem:[#allocation7 + $0xc8] ss:$16 sps:$4 sm:$0xff]  }
  0x45   :  { %1052 = vmatprep.subr.bf16.mxu0 %v1418_v22  ;;  %v1451_v44 = vld [vmem:[#allocation7 + $0xec] ss:$16 sps:$4 sm:$0xff]   ;;  %v1446_v45 = vld [vmem:[#allocation7 + $0xe0] ss:$16 sps:$4 sm:$0xff]   ;;  %v1454_v46 = vld [vmem:[#allocation7 + $0x104] ss:$16 sps:$4 sm:$0xff]  }
  0x46   :  { %v1449_v47 = vld [vmem:[#allocation7 + $0xe8] ss:$16 sps:$4 sm:$0xff]   ;;  %v1457_v48 = vld [vmem:[#allocation7 + $0x10c] ss:$16 sps:$4 sm:$0xff]   ;;  %v1452_v49 = vld [vmem:[#allocation7 + $0x100] ss:$16 sps:$4 sm:$0xff]  }
  0x47   :  { %1133 = vmatpush1.bf16.msra.mxu1 %v1413_v23  ;;  %v1460_v50 = vld [vmem:[#allocation7 + $0x124] ss:$16 sps:$4 sm:$0xff]   ;;  %v1455_v51 = vld [vmem:[#allocation7 + $0x108] ss:$16 sps:$4 sm:$0xff]   ;;  %v1458_v52 = vld [vmem:[#allocation7 + $0x120] ss:$16 sps:$4 sm:$0xff]  }
  0x48   :  { %1134 = vmatprep.subr.bf16.mxu1 %v1421_v24  ;;  %1053 = vmatpush1.bf16.msra.mxu0 %v1416_v25  ;;  %v1463_v53 = vld [vmem:[#allocation7 + $0x12c] ss:$16 sps:$4 sm:$0xff]   ;;  %v1461_v54 = vld [vmem:[#allocation7 + $0x128] ss:$16 sps:$4 sm:$0xff]   ;;  %v1466_v55 = vld [vmem:[#allocation7 + $0x144] ss:$16 sps:$4 sm:$0xff]  }
  0x49   :  { %1054 = vmatprep.subr.bf16.mxu0 %v1424_v26  ;;  %v1469_v56 = vld [vmem:[#allocation7 + $0x14c] ss:$16 sps:$4 sm:$0xff]   ;;  %v1464_v57 = vld [vmem:[#allocation7 + $0x140] ss:$16 sps:$4 sm:$0xff]   ;;  %v1472_v58 = vld [vmem:[#allocation7 + $0x164] ss:$16 sps:$4 sm:$0xff]  }
  0x4a   :  { %v1467_v59 = vld [vmem:[#allocation7 + $0x148] ss:$16 sps:$4 sm:$0xff]   ;;  %v1475_v60 = vld [vmem:[#allocation7 + $0x16c] ss:$16 sps:$4 sm:$0xff]   ;;  %v1470_v61 = vld [vmem:[#allocation7 + $0x160] ss:$16 sps:$4 sm:$0xff]  }
  0x4b   :  { %1135 = vmatpush1.bf16.msra.mxu1 %v1419_v27  ;;  %v1478_v62 = vld [vmem:[#allocation7 + $0x184] ss:$16 sps:$4 sm:$0xff]   ;;  %v1473_v63 = vld [vmem:[#allocation7 + $0x168] ss:$16 sps:$4 sm:$0xff]   ;;  %v1481_v0 = vld [vmem:[#allocation7 + $0x18c] ss:$16 sps:$4 sm:$0xff]  }
  0x4c   :  { %1136 = vmatprep.subr.bf16.mxu1 %v1427_v28  ;;  %1055 = vmatpush1.bf16.msra.mxu0 %v1422_v29  ;;  %v1476_v1 = vld [vmem:[#allocation7 + $0x180] ss:$16 sps:$4 sm:$0xff]   ;;  %v1484_v2 = vld [vmem:[#allocation7 + $0x1a4] ss:$16 sps:$4 sm:$0xff]   ;;  %v1479_v3 = vld [vmem:[#allocation7 + $0x188] ss:$16 sps:$4 sm:$0xff]  }
  0x4d   :  { %1056 = vmatprep.subr.bf16.mxu0 %v1430_v30  ;;  %v1487_v4 = vld [vmem:[#allocation7 + $0x1ac] ss:$16 sps:$4 sm:$0xff]   ;;  %v1482_v5 = vld [vmem:[#allocation7 + $0x1a0] ss:$16 sps:$4 sm:$0xff]   ;;  %v1485_v6 = vld [vmem:[#allocation7 + $0x1a8] ss:$16 sps:$4 sm:$0xff]  }
  0x4e   :  { %v1490_v7 = vld [vmem:[#allocation7 + $0x1c4] ss:$16 sps:$4 sm:$0xff]   ;;  %v1493_v8 = vld [vmem:[#allocation7 + $0x1cc] ss:$16 sps:$4 sm:$0xff]   ;;  %v1488_v9 = vld [vmem:[#allocation7 + $0x1c0] ss:$16 sps:$4 sm:$0xff]  }
  0x4f   :  { %1137 = vmatpush1.bf16.msra.mxu1 %v1425_v31  ;;  %v1491_v10 = vld [vmem:[#allocation7 + $0x1c8] ss:$16 sps:$4 sm:$0xff]   ;;  %v1496_v11 = vld [vmem:[#allocation7 + $0x1e4] ss:$16 sps:$4 sm:$0xff]   ;;  %v1499_v12 = vld [vmem:[#allocation7 + $0x1ec] ss:$16 sps:$4 sm:$0xff]  }
  0x50   :  { %1138 = vmatprep.subr.bf16.mxu1 %v1433_v32  ;;  %1057 = vmatpush1.bf16.msra.mxu0 %v1428_v33  ;;  %v1494_v13 = vld [vmem:[#allocation7 + $0x1e0] ss:$16 sps:$4 sm:$0xff]   ;;  %v1497_v14 = vld [vmem:[#allocation7 + $0x1e8] ss:$16 sps:$4 sm:$0xff]   ;;  %v1502_v15 = vld [vmem:[#allocation7 + $0x204] ss:$16 sps:$4 sm:$0xff]  }
  0x51   :  { %1058 = vmatprep.subr.bf16.mxu0 %v1436_v34  ;;  %v1505_v16 = vld [vmem:[#allocation7 + $0x20c] ss:$16 sps:$4 sm:$0xff]   ;;  %v1778_v18 = vshrl.u32 %v71_v17, 7  ;;  %v1784_v20 = vld [vmem:[%s1825_s2] sm:$0xf] }
  0x52   :  { %v1568_v17 = vld [vmem:[#allocation7 + $0x364] ss:$16 sps:$4 sm:$0xff]  }
  0x53   :  { %1139 = vmatpush1.bf16.msra.mxu1 %v1431_v35  ;;  %v73_v19 = vsub.s32 0, %v1778_v18  ;;  %v77_v21 = vsub.s32 1, %v1778_v18  ;;  %v85_v22 = vsub.s32 3, %v1778_v18 }
  0x54   :  { %1140 = vmatprep.subr.bf16.mxu1 %v1439_v36  ;;  %1059 = vmatpush1.bf16.msra.mxu0 %v1434_v37  ;;  %v1500_v36 = vld [vmem:[#allocation7 + $0x200] ss:$16 sps:$4 sm:$0xff]   ;;  %v1503_v37 = vld [vmem:[#allocation7 + $0x208] ss:$16 sps:$4 sm:$0xff]  }
  0x55   :  { %1060 = vmatprep.subr.bf16.mxu0 %v1442_v38  ;;  %v74_v23 = vrot.slane %v1784_v20, %v73_v19  ;;  %v78_v24 = vrot.slane %v1784_v20, %v77_v21  ;;  %v86_v26 = vrot.slane %v1784_v20, %v85_v22 }
  0x57   :  { %1141 = vmatpush1.bf16.msra.mxu1 %v1437_v39 }
  0x58   :  { %1142 = vmatprep.subr.bf16.mxu1 %v1445_v40  ;;  %1061 = vmatpush1.bf16.msra.mxu0 %v1440_v41  ;;  %v1508_v40 = vld [vmem:[#allocation7 + $0x224] ss:$16 sps:$4 sm:$0xff]   ;;  %v1511_v41 = vld [vmem:[#allocation7 + $0x22c] ss:$16 sps:$4 sm:$0xff]  }
  0x59   :  { %1062 = vmatprep.subr.bf16.mxu0 %v1448_v42 }
  0x5b   :  { %1143 = vmatpush1.bf16.msra.mxu1 %v1443_v43  ;;  %v1506_v43 = vld [vmem:[#allocation7 + $0x220] ss:$16 sps:$4 sm:$0xff]  }
  0x5c   :  { %1144 = vmatprep.subr.bf16.mxu1 %v1451_v44  ;;  %1063 = vmatpush1.bf16.msra.mxu0 %v1446_v45  ;;  %v1509_v44 = vld [vmem:[#allocation7 + $0x228] ss:$16 sps:$4 sm:$0xff]   ;;  %v1514_v45 = vld [vmem:[#allocation7 + $0x244] ss:$16 sps:$4 sm:$0xff]  }
  0x5d   :  { %1064 = vmatprep.subr.bf16.mxu0 %v1454_v46  ;;  %v1517_v46 = vld [vmem:[#allocation7 + $0x24c] ss:$16 sps:$4 sm:$0xff]  }
  0x5f   :  { %1145 = vmatpush1.bf16.msra.mxu1 %v1449_v47  ;;  %v1512_v47 = vld [vmem:[#allocation7 + $0x240] ss:$16 sps:$4 sm:$0xff]  }
  0x60   :  { %1146 = vmatprep.subr.bf16.mxu1 %v1457_v48  ;;  %1065 = vmatpush1.bf16.msra.mxu0 %v1452_v49  ;;  %v1515_v48 = vld [vmem:[#allocation7 + $0x248] ss:$16 sps:$4 sm:$0xff]   ;;  %v1520_v49 = vld [vmem:[#allocation7 + $0x264] ss:$16 sps:$4 sm:$0xff]  }
  0x61   :  { %1066 = vmatprep.subr.bf16.mxu0 %v1460_v50  ;;  %v1523_v50 = vld [vmem:[#allocation7 + $0x26c] ss:$16 sps:$4 sm:$0xff]  }
  0x63   :  { %1147 = vmatpush1.bf16.msra.mxu1 %v1455_v51  ;;  %v1518_v51 = vld [vmem:[#allocation7 + $0x260] ss:$16 sps:$4 sm:$0xff]  }
  0x64   :  { %1148 = vmatprep.subr.bf16.mxu1 %v1463_v53  ;;  %1067 = vmatpush1.bf16.msra.mxu0 %v1458_v52  ;;  %v1521_v52 = vld [vmem:[#allocation7 + $0x268] ss:$16 sps:$4 sm:$0xff]   ;;  %v1526_v53 = vld [vmem:[#allocation7 + $0x284] ss:$16 sps:$4 sm:$0xff]  }
  0x65   :  { %1068 = vmatprep.subr.bf16.mxu0 %v1466_v55  ;;  %v1524_v55 = vld [vmem:[#allocation7 + $0x280] ss:$16 sps:$4 sm:$0xff]  }
  0x67   :  { %1149 = vmatpush1.bf16.msra.mxu1 %v1461_v54  ;;  %v1529_v54 = vld [vmem:[#allocation7 + $0x28c] ss:$16 sps:$4 sm:$0xff]  }
  0x68   :  { %1150 = vmatprep.subr.bf16.mxu1 %v1469_v56  ;;  %1069 = vmatpush1.bf16.msra.mxu0 %v1464_v57  ;;  %v1527_v56 = vld [vmem:[#allocation7 + $0x288] ss:$16 sps:$4 sm:$0xff]   ;;  %v1532_v57 = vld [vmem:[#allocation7 + $0x2a4] ss:$16 sps:$4 sm:$0xff]  }
  0x69   :  { %1070 = vmatprep.subr.bf16.mxu0 %v1472_v58  ;;  %v1535_v58 = vld [vmem:[#allocation7 + $0x2ac] ss:$16 sps:$4 sm:$0xff]  }
  0x6b   :  { %1151 = vmatpush1.bf16.msra.mxu1 %v1467_v59  ;;  %v1530_v59 = vld [vmem:[#allocation7 + $0x2a0] ss:$16 sps:$4 sm:$0xff]  }
  0x6c   :  { %1152 = vmatprep.subr.bf16.mxu1 %v1475_v60  ;;  %1071 = vmatpush1.bf16.msra.mxu0 %v1470_v61  ;;  %v1533_v60 = vld [vmem:[#allocation7 + $0x2a8] ss:$16 sps:$4 sm:$0xff]   ;;  %v1538_v61 = vld [vmem:[#allocation7 + $0x2c4] ss:$16 sps:$4 sm:$0xff]  }
  0x6d   :  { %1072 = vmatprep.subr.bf16.mxu0 %v1478_v62  ;;  %v1541_v62 = vld [vmem:[#allocation7 + $0x2cc] ss:$16 sps:$4 sm:$0xff]  }
  0x6f   :  { %1153 = vmatpush1.bf16.msra.mxu1 %v1473_v63  ;;  %v1536_v63 = vld [vmem:[#allocation7 + $0x2c0] ss:$16 sps:$4 sm:$0xff]  }
  0x70   :  { %1154 = vmatprep.subr.bf16.mxu1 %v1481_v0  ;;  %1073 = vmatpush1.bf16.msra.mxu0 %v1476_v1  ;;  %v1539_v0 = vld [vmem:[#allocation7 + $0x2c8] ss:$16 sps:$4 sm:$0xff]   ;;  %v1544_v1 = vld [vmem:[#allocation7 + $0x2e4] ss:$16 sps:$4 sm:$0xff]  }
  0x71   :  { %1074 = vmatprep.subr.bf16.mxu0 %v1484_v2  ;;  %v1547_v2 = vld [vmem:[#allocation7 + $0x2ec] ss:$16 sps:$4 sm:$0xff]  }
  0x73   :  { %1155 = vmatpush1.bf16.msra.mxu1 %v1479_v3  ;;  %v1542_v3 = vld [vmem:[#allocation7 + $0x2e0] ss:$16 sps:$4 sm:$0xff]  }
  0x74   :  { %1156 = vmatprep.subr.bf16.mxu1 %v1487_v4  ;;  %1075 = vmatpush1.bf16.msra.mxu0 %v1482_v5  ;;  %v1545_v4 = vld [vmem:[#allocation7 + $0x2e8] ss:$16 sps:$4 sm:$0xff]   ;;  %v1550_v5 = vld [vmem:[#allocation7 + $0x304] ss:$16 sps:$4 sm:$0xff]  }
  0x75   :  { %1076 = vmatprep.subr.bf16.mxu0 %v1490_v7  ;;  %v1548_v7 = vld [vmem:[#allocation7 + $0x300] ss:$16 sps:$4 sm:$0xff]  }
  0x77   :  { %1157 = vmatpush1.bf16.msra.mxu1 %v1485_v6  ;;  %v1553_v6 = vld [vmem:[#allocation7 + $0x30c] ss:$16 sps:$4 sm:$0xff]  }
  0x78   :  { %1158 = vmatprep.subr.bf16.mxu1 %v1493_v8  ;;  %1077 = vmatpush1.bf16.msra.mxu0 %v1488_v9  ;;  %v1551_v8 = vld [vmem:[#allocation7 + $0x308] ss:$16 sps:$4 sm:$0xff]   ;;  %v1556_v9 = vld [vmem:[#allocation7 + $0x324] ss:$16 sps:$4 sm:$0xff]  }
  0x79   :  { %1078 = vmatprep.subr.bf16.mxu0 %v1496_v11  ;;  %v1554_v11 = vld [vmem:[#allocation7 + $0x320] ss:$16 sps:$4 sm:$0xff]  }
  0x7b   :  { %1159 = vmatpush1.bf16.msra.mxu1 %v1491_v10  ;;  %v1559_v10 = vld [vmem:[#allocation7 + $0x32c] ss:$16 sps:$4 sm:$0xff]  }
  0x7c   :  { %1160 = vmatprep.subr.bf16.mxu1 %v1499_v12  ;;  %1079 = vmatpush1.bf16.msra.mxu0 %v1494_v13  ;;  %v1557_v12 = vld [vmem:[#allocation7 + $0x328] ss:$16 sps:$4 sm:$0xff]   ;;  %v1562_v13 = vld [vmem:[#allocation7 + $0x344] ss:$16 sps:$4 sm:$0xff]  }
  0x7d   :  { %1089 = vmatprep.subr.bf16.mxu0 %v1502_v15  ;;  %v1560_v15 = vld [vmem:[#allocation7 + $0x340] ss:$16 sps:$4 sm:$0xff]  }
  0x7f   :  { %1161 = vmatpush1.bf16.msra.mxu1 %v1497_v14  ;;  %v1565_v14 = vld [vmem:[#allocation7 + $0x34c] ss:$16 sps:$4 sm:$0xff]  }
  0x80   :  { %1171 = vmatprep.subr.bf16.mxu1 %v1505_v16  ;;  %v1563_v16 = vld [vmem:[#allocation7 + $0x348] ss:$16 sps:$4 sm:$0xff]  }
 0x112   :  { %v174_v25 = vpop.f32.mrb[0].mxu0 }
 0x113   :  { %v175_v27 = vadd.f32 %v174_v25, %v74_v23  ;;  %v176_v28 = vpop.f32.mrb[1].mxu0  ;;  %v1571_v23 = vld [vmem:[#allocation7 + $0x36c] ss:$16 sps:$4 sm:$0xff]   ;;  %v1569_v25 = vld [vmem:[#allocation7 + $0x368] ss:$16 sps:$4 sm:$0xff]  }
 0x114   :  { %v177_v29 = vadd.f32 %v176_v28, %v78_v24  ;;  %v1566_v24 = vld [vmem:[#allocation7 + $0x360] ss:$16 sps:$4 sm:$0xff]  }
 0x115   :  { %v1797_v30 = vpop.f32.mrb[0].mxu1  ;;  %v250_v31 = vmax.f32 %v175_v27, 0.0  ;;  %v1577_v27 = vld [vmem:[#allocation7 + $0x38c] ss:$16 sps:$4 sm:$0xff]   ;;  %v1572_v28 = vld [vmem:[#allocation7 + $0x380] ss:$16 sps:$4 sm:$0xff]  }
 0x116   :  { %v247_v32 = vpop.f32.mrb[1].mxu1  ;;  %v251_v33 = vmax.f32 %v177_v29, 0.0  ;;  %v1575_v29 = vld [vmem:[#allocation7 + $0x388] ss:$16 sps:$4 sm:$0xff]  }
 0x117   :  { %v248_v34 = vadd.f32 %v247_v32, %v86_v26  ;;  %v254_v39 = vpack.c.bf16 %v250_v31, %v250_v31  ;;  %v1574_v26 = vld [vmem:[#allocation7 + $0x384] ss:$16 sps:$4 sm:$0xff]   ;;  %v1583_v32 = vld [vmem:[#allocation7 + $0x3ac] ss:$16 sps:$4 sm:$0xff]  }
 0x118   :  { %v255_v35 = vpack.c.bf16 %v251_v33, %v251_v33  ;;  %v1580_v31 = vld [vmem:[#allocation7 + $0x3a4] ss:$16 sps:$4 sm:$0xff]   ;;  %v81_v33 = vsub.s32 2, %v1778_v18 }
 0x119   :  { %v253_v38 = vmax.f32 %v248_v34, 0.0  ;;  %v1578_v34 = vld [vmem:[#allocation7 + $0x3a0] ss:$16 sps:$4 sm:$0xff]  }
 0x11a   :  { %1080 = vmatprep.mubr.bf16.mxu0 %v255_v35  ;;  %1162 = vmatprep.mubr.bf16.mxu1 %v255_v35  ;;  %v1581_v35 = vld [vmem:[#allocation7 + $0x3a8] ss:$16 sps:$4 sm:$0xff]  }
 0x11b   :  { %v257_v42 = vpack.c.bf16 %v253_v38, %v253_v38  ;;  %1081 = vmatmul.mubr.bf16.vlgmr.msra.gmra.mrb[4].mxu0 %v254_v39  ;;  %1163 = vmatmul.mubr.bf16.vlgmr.msra.gmra.mrb[4].mxu1 %v254_v39  ;;  %v1589_v38 = vld [vmem:[#allocation7 + $0x3cc] ss:$16 sps:$4 sm:$0xff]   ;;  %v1584_v39 = vld [vmem:[#allocation7 + $0x3c0] ss:$16 sps:$4 sm:$0xff]  }
 0x11c   :  { %1090 = vmatpush1.bf16.msra.mxu0 %v1500_v36  ;;  %1172 = vmatpush1.bf16.msra.mxu1 %v1503_v37  ;;  %v82_v36 = vrot.slane %v1784_v20, %v81_v33  ;;  %v1586_v37 = vld [vmem:[#allocation7 + $0x3c4] ss:$16 sps:$4 sm:$0xff]  }
 0x11d   :  { %1091 = vmatprep.subr.bf16.mxu0 %v1508_v40  ;;  %1173 = vmatprep.subr.bf16.mxu1 %v1511_v41  ;;  %v1587_v40 = vld [vmem:[#allocation7 + $0x3c8] ss:$16 sps:$4 sm:$0xff]  }
 0x11e   :  { %1121 = vmatprep.mubr.bf16.mxu0 %v257_v42  ;;  %1203 = vmatprep.mubr.bf16.mxu1 %v257_v42  ;;  %v246_v41 = vadd.f32 %v1797_v30, %v82_v36  ;;  %v1592_v42 = vld [vmem:[#allocation7 + $0x3e4] ss:$16 sps:$4 sm:$0xff]   ;;  %v386_v30 = vld [vmem:[%s1827_s4] sm:$0xf]  ;;  %s1662_s4 = scalar_lea.vmem %s1227_s9, 512 }
 0x11f   :  { %p1663_p10 = scmp.ne.s32.totalorder %s1227_s9, %s1662_s4  ;;  %p1668_p12 = scmp.lt.s32.totalorder %s1662_s4, %s1662_s4 }
 0x120   :  { %1092 = vmatpush1.bf16.msra.mxu0 %v1506_v43  ;;  %1174 = vmatpush1.bf16.msra.mxu1 %v1509_v44  ;;  %v1595_v43 = vld [vmem:[#allocation7 + $0x3ec] ss:$16 sps:$4 sm:$0xff]   ;;  %v1590_v44 = vld [vmem:[#allocation7 + $0x3e0] ss:$16 sps:$4 sm:$0xff]  }
 0x121   :  { %1093 = vmatprep.subr.bf16.mxu0 %v1514_v45  ;;  %1175 = vmatprep.subr.bf16.mxu1 %v1517_v46  ;;  %v1593_v45 = vld [vmem:[#allocation7 + $0x3e8] ss:$16 sps:$4 sm:$0xff]   ;;  %v252_v46 = vmax.f32 %v246_v41, 0.0  ;;  %p1669_p13 = por %p1668_p12, %p1667_p11 }
 0x123   :  { %v256_v20 = vpack.c.bf16 %v252_v46, %v252_v46  ;;  %p1670_p0 = pnand %p1669_p13, %p1663_p10 }
 0x124   :  { %1094 = vmatpush1.bf16.msra.mxu0 %v1512_v47  ;;  %1176 = vmatpush1.bf16.msra.mxu1 %v1515_v48  ;;  %v391_v47 = vrot.slane %v386_v30, %v73_v19  ;;  %v399_v48 = vrot.slane %v386_v30, %v81_v33 }
 0x125   :  { %1095 = vmatprep.subr.bf16.mxu0 %v1520_v49  ;;  %1177 = vmatprep.subr.bf16.mxu1 %v1523_v50  ;;  %v395_v49 = vrot.slane %v386_v30, %v77_v21  ;;  %v403_v50 = vrot.slane %v386_v30, %v85_v22 }
 0x128   :  { %1096 = vmatpush1.bf16.msra.mxu0 %v1518_v51  ;;  %1178 = vmatpush1.bf16.msra.mxu1 %v1521_v52 }
 0x129   :  { %1097 = vmatprep.subr.bf16.mxu0 %v1526_v53  ;;  %1179 = vmatprep.subr.bf16.mxu1 %v1529_v54 }
 0x12c   :  { %1098 = vmatpush1.bf16.msra.mxu0 %v1524_v55  ;;  %1180 = vmatpush1.bf16.msra.mxu1 %v1527_v56 }
 0x12d   :  { %1099 = vmatprep.subr.bf16.mxu0 %v1532_v57  ;;  %1181 = vmatprep.subr.bf16.mxu1 %v1535_v58 }
 0x130   :  { %1100 = vmatpush1.bf16.msra.mxu0 %v1530_v59  ;;  %1182 = vmatpush1.bf16.msra.mxu1 %v1533_v60 }
 0x131   :  { %1101 = vmatprep.subr.bf16.mxu0 %v1538_v61  ;;  %1183 = vmatprep.subr.bf16.mxu1 %v1541_v62 }
 0x134   :  { %1102 = vmatpush1.bf16.msra.mxu0 %v1536_v63  ;;  %1184 = vmatpush1.bf16.msra.mxu1 %v1539_v0 }
 0x135   :  { %1103 = vmatprep.subr.bf16.mxu0 %v1544_v1  ;;  %1185 = vmatprep.subr.bf16.mxu1 %v1547_v2 }
 0x138   :  { %1104 = vmatpush1.bf16.msra.mxu0 %v1542_v3  ;;  %1186 = vmatpush1.bf16.msra.mxu1 %v1545_v4 }
 0x139   :  { %1105 = vmatprep.subr.bf16.mxu0 %v1550_v5  ;;  %1187 = vmatprep.subr.bf16.mxu1 %v1553_v6 }
 0x13c   :  { %1106 = vmatpush1.bf16.msra.mxu0 %v1548_v7  ;;  %1188 = vmatpush1.bf16.msra.mxu1 %v1551_v8 }
 0x13d   :  { %1107 = vmatprep.subr.bf16.mxu0 %v1556_v9  ;;  %1189 = vmatprep.subr.bf16.mxu1 %v1559_v10 }
 0x140   :  { %1108 = vmatpush1.bf16.msra.mxu0 %v1554_v11  ;;  %1190 = vmatpush1.bf16.msra.mxu1 %v1557_v12 }
 0x141   :  { %1109 = vmatprep.subr.bf16.mxu0 %v1562_v13  ;;  %1191 = vmatprep.subr.bf16.mxu1 %v1565_v14 }
 0x144   :  { %1110 = vmatpush1.bf16.msra.mxu0 %v1560_v15  ;;  %1192 = vmatpush1.bf16.msra.mxu1 %v1563_v16 }
 0x145   :  { %1111 = vmatprep.subr.bf16.mxu0 %v1568_v17  ;;  %1193 = vmatprep.subr.bf16.mxu1 %v1571_v23 }
 0x148   :  { %1112 = vmatpush1.bf16.msra.mxu0 %v1566_v24  ;;  %1194 = vmatpush1.bf16.msra.mxu1 %v1569_v25 }
 0x149   :  { %1113 = vmatprep.subr.bf16.mxu0 %v1574_v26  ;;  %1195 = vmatprep.subr.bf16.mxu1 %v1577_v27 }
 0x14c   :  { %1114 = vmatpush1.bf16.msra.mxu0 %v1572_v28  ;;  %1196 = vmatpush1.bf16.msra.mxu1 %v1575_v29 }
 0x14d   :  { %1115 = vmatprep.subr.bf16.mxu0 %v1580_v31  ;;  %1197 = vmatprep.subr.bf16.mxu1 %v1583_v32 }
 0x150   :  { %1116 = vmatpush1.bf16.msra.mxu0 %v1578_v34  ;;  %1198 = vmatpush1.bf16.msra.mxu1 %v1581_v35 }
 0x151   :  { %1117 = vmatprep.subr.bf16.mxu0 %v1586_v37  ;;  %1199 = vmatprep.subr.bf16.mxu1 %v1589_v38 }
 0x154   :  { %1118 = vmatpush1.bf16.msra.mxu0 %v1584_v39  ;;  %1200 = vmatpush1.bf16.msra.mxu1 %v1587_v40 }
 0x155   :  { %1119 = vmatprep.subr.bf16.mxu0 %v1592_v42  ;;  %1201 = vmatprep.subr.bf16.mxu1 %v1595_v43 }
 0x158   :  { %1120 = vmatpush1.bf16.msra.mxu0 %v1590_v44  ;;  %1202 = vmatpush1.bf16.msra.mxu1 %v1593_v45 }
 0x15b   :  { %1122 = vmatmul.mubr.bf16.vlgmr.msra.gmra.mrb[4].mxu0 %v256_v20  ;;  %1204 = vmatmul.mubr.bf16.vlgmr.msra.gmra.mrb[4].mxu1 %v256_v20 }
 0x22e   :  { %v1123_v51 = vpop.f32.mrb[4].mxu0  ;;  %v1205_v52 = vpop.f32.mrb[4].mxu1 }
 0x22f   :  { %v1382_v53 = vadd.f32 %v1123_v51, %v391_v47  ;;  %v1384_v54 = vadd.f32 %v1205_v52, %v399_v48  ;;  %v1125_v55 = vpop.f32.mrb[5].mxu0  ;;  %v1207_v56 = vpop.f32.mrb[5].mxu1 }
 0x230   :  { %v1383_v57 = vadd.f32 %v1125_v55, %v395_v49  ;;  %v1385_v58 = vadd.f32 %v1207_v56, %v403_v50  ;;  %v1127_v59 = vpop.f32.mrb[6].mxu0  ;;  %v1209_v60 = vpop.f32.mrb[6].mxu1 }
 0x231   :  { %v1212_v19 = vmax.f32 %v1382_v53, 0.0  ;;  %v1214_v61 = vmax.f32 %v1384_v54, 0.0  ;;  %v1128_v62 = vpop.f32.mrb[7].mxu0  ;;  %v1210_v63 = vpop.f32.mrb[7].mxu1 }
 0x232   :  { %v1213_v21 = vmax.f32 %v1383_v57, 0.0  ;;  %v1215_v0 = vmax.f32 %v1385_v58, 0.0 }
 0x233   :  { %1216 = vst [vmem:[#allocation8] sm:$0xff] %v1212_v19  ;;  %1218 = vst [vmem:[#allocation8 + $0x10] sm:$0xff] %v1214_v61 }
 0x234   :  { %1217 = vst [vmem:[#allocation8 + $0x8] sm:$0xff] %v1213_v21  ;;  %1219 = vst [vmem:[#allocation8 + $0x18] sm:$0xff] %v1215_v0 }
 0x235   :  { %1673 = shalt.err (!%p1670_p0)
}
 0x236   :  { %s1674_s12 = scalar_lea.hbm %s1828_s5, 512 }
 0x237   :  { %p1675_p1 = scmp.ne.s32.totalorder %s1828_s5, %s1674_s12  ;;  %p1678_p2 = scmp.lt.u32.totalorder %s1674_s12, %s1828_s5 }
 0x239   :  { %p1680_p3 = pnand %p1678_p2, %p1675_p1 }
 0x23b   :  { %1683 = shalt.err (!%p1680_p3)
}
 0x23c   :  { %1229 = dma.vmem_to_hbm [thread:$0]  %s1227_s9, 512, %s1828_s5, [#allocation4]  }
 0x23d   :  { %1688 = dma.done.wait [#allocation4], 512  }
 0x23e   :  { %1689 = vsyncadd [#allocation4], 4294966784 }
 0x23f   :  { %1233 = vsyncpa [#allocation3], 1 }
 0x240   :  { %1234 = vsyncpa [#allocation6], 1 }
 0x241   :  { %1235 = vsyncpa [#allocation4], 1 }

</bundles_post_ra>
